<compile_context>
chip_gen: v7x
topology: tpu7x:2x2x1
jax: 0.10.0
libtpu: 0.0.40
codegen_flags: <defaults>
</compile_context>

<pallas_src>
import functools

import jax
import jax.numpy as jnp
from jax.experimental import pallas as pl
from jax.experimental.pallas import tpu as pltpu


def _label_smoothing_kernel(pred_ref, tar_ref, num_ref, den_ref, *,
                            smoothing, masked, n_valid, tile_n, num_cores):
    c = pl.program_id(0)   # TensorCore shard ("parallel")
    i = pl.program_id(1)   # row-tile step within this shard ("arbitrary")

    @pl.when(i == 0)
    def _():
        num_ref[...] = jnp.zeros_like(num_ref)
        den_ref[...] = jnp.zeros_like(den_ref)

    # Logical first row of this grid step (interleaved tile assignment).
    row0 = (i * num_cores + c) * tile_n

    # Overhanging (clamped-duplicate) grid steps contribute nothing: skip all
    # compute; only the DMA of an already-fetched tile remains.
    @pl.when(row0 < n_valid)
    def _():
        x = pred_ref[...].astype(jnp.float32)        # (TN, V); f32 math
        tar = tar_ref[...]                           # (TN, 1) int32
        v = x.shape[-1]

        # Stable log-softmax pieces WITHOUT materializing logp:
        #   logp = (x - m) - lse,  lse = log(sum(exp(x - m)))
        m = jnp.max(x, axis=-1, keepdims=True)       # (TN, 1)
        z = x - m
        lse = jnp.log(jnp.sum(jnp.exp(z), axis=-1, keepdims=True))

        col = jax.lax.broadcasted_iota(jnp.int32, z.shape, 1)
        z_tar = jnp.sum(jnp.where(col == tar, z, 0.0), axis=-1, keepdims=True)
        sum_z = jnp.sum(z, axis=-1, keepdims=True)

        # loss = -(1-s)*logp[tar] - (s/V)*sum(logp)
        loss = -((1.0 - smoothing) * (z_tar - lse)
                 + (smoothing / v) * (sum_z - v * lse))      # (TN, 1)

        # Per-row validity (rows past N in a partial last block are garbage).
        row = row0 + jax.lax.broadcasted_iota(jnp.int32, (tile_n, 1), 0)
        valid = row < n_valid
        if masked:
            valid = jnp.logical_and(valid, tar != 0)

        # Per-row SELECT (not multiply) so NaN/Inf garbage in partial blocks
        # can never poison the running sums.
        num_ref[...] += jnp.sum(jnp.where(valid, loss, 0.0))
        den_ref[...] += jnp.sum(valid.astype(jnp.float32))


def _vmem_capacity_bytes():
    try:
        return int(pltpu.get_tpu_info().vmem_capacity_bytes)
    except Exception:
        return 64 * 1024 * 1024        # conservative (v7x per-TC VMEM)


def _single_tensorcore_chip():
    # v5e / v6e ("lite") chips have a single TensorCore; the 2-way parallel
    # axis would just be a serial loop there.
    try:
        kind = jax.devices()[0].device_kind.lower()
    except Exception:
        return False
    return ("lite" in kind) or ("v5e" in kind) or ("v6e" in kind)


def label_smoothing_loss(y_pred, y_tar, *, smoothing, masked=True, tile_n=None):
    """y_pred: (..., V) float32/bfloat16; y_tar: (...,) int. Returns scalar f32 loss."""
    V = y_pred.shape[-1]
    y_pred = y_pred.reshape(-1, V)
    y_tar = y_tar.reshape(-1, 1).astype(jnp.int32)
    N = y_pred.shape[0]
    itemsize = jnp.dtype(y_pred.dtype).itemsize

    vmem_cap = _vmem_capacity_bytes()
    # Generation-aware block budget: double-buffered input block plus ~5 live
    # f32 (tile_n, V) intermediates must fit.
    budget = (92 << 20) if vmem_cap >= (96 << 20) else (26 << 20)

    if tile_n is None:
        per_row_bytes = V * (2 * itemsize + 5 * 4)
        tile_n = max(8, ((budget // per_row_bytes) // 8) * 8)
    assert tile_n % 8 == 0, "tile_n must be a multiple of 8"
    tile_n = min(tile_n, max(8, -(-N // 8) * 8))          # no bigger than needed

    num_tiles = -(-N // tile_n)
    num_cores = 1 if (_single_tensorcore_chip() or num_tiles < 2) else 2
    steps_per_core = -(-num_tiles // num_cores)

    # No host-side padding of the logits: partial last block handled in-kernel;
    # overhanging grid steps clamp to the last real tile (and skip compute).
    def in_map(c, i):
        return (jnp.minimum(i * num_cores + c, num_tiles - 1), 0)

    pred_block_bytes = tile_n * V * itemsize
    est_bytes = 2 * pred_block_bytes + 5 * tile_n * V * 4 + (2 << 20)
    vmem_limit = int(min(vmem_cap - (8 << 20), est_bytes + (16 << 20)))
    vmem_limit = max(vmem_limit, 16 << 20)

    kernel = functools.partial(
        _label_smoothing_kernel,
        smoothing=float(smoothing), masked=bool(masked),
        n_valid=N, tile_n=tile_n, num_cores=num_cores)

    num, den = pl.pallas_call(
        kernel,
        out_shape=(
            jax.ShapeDtypeStruct((num_cores, 1, 1), jnp.float32),
            jax.ShapeDtypeStruct((num_cores, 1, 1), jnp.float32),
        ),
        grid_spec=pltpu.PrefetchScalarGridSpec(
            num_scalar_prefetch=0,
            grid=(num_cores, steps_per_core),
            in_specs=[
                pl.BlockSpec((tile_n, V), in_map),
                pl.BlockSpec((tile_n, 1), in_map),
            ],
            out_specs=[
                pl.BlockSpec((None, 1, 1), lambda c, i: (c, 0, 0)),
                pl.BlockSpec((None, 1, 1), lambda c, i: (c, 0, 0)),
            ],
        ),
        compiler_params=pltpu.CompilerParams(
            dimension_semantics=("parallel", "arbitrary"),
            vmem_limit_bytes=vmem_limit),
    )(y_pred, y_tar)

    return (jnp.sum(num) / jnp.sum(den)).astype(jnp.float32)


def _reference_loss(y_pred, y_tar, smoothing, masked=True):
    logp = jax.nn.log_softmax(y_pred.astype(jnp.float32), axis=-1)
    nll = -jnp.take_along_axis(
        logp, y_tar[:, None].astype(jnp.int32), axis=-1)[:, 0] * (1.0 - smoothing)
    smooth = -jnp.mean(logp, axis=-1) * smoothing
    loss = nll + smooth
    if masked:
        mask = (y_tar != 0).astype(loss.dtype)
        return jnp.sum(loss * mask) / jnp.sum(mask)
    return jnp.mean(loss)


if __name__ == "__main__":
    key = jax.random.PRNGKey(0)
    k1, k2, k3, k4 = jax.random.split(key, 4)
    smoothing = 0.1

    # case 1: small divisible shapes, f32, masked & unmasked
    N, V = 16, 128
    y_pred = jax.random.normal(k1, (N, V), dtype=jnp.float32)
    y_tar = jax.random.randint(k2, (N,), 0, V, dtype=jnp.int32)
    y_tar = y_tar.at[0].set(0)   # ensure the mask path is exercised

    out = jax.block_until_ready(
        label_smoothing_loss(y_pred, y_tar, smoothing=smoothing, masked=True))
    ref = _reference_loss(y_pred, y_tar, smoothing, masked=True)
    assert jnp.allclose(out, ref, atol=1e-5, rtol=1e-5), (out, ref)

    out_u = jax.block_until_ready(
        label_smoothing_loss(y_pred, y_tar, smoothing=smoothing, masked=False))
    ref_u = _reference_loss(y_pred, y_tar, smoothing, masked=False)
    assert jnp.allclose(out_u, ref_u, atol=1e-5, rtol=1e-5), (out_u, ref_u)

    # case 2: N not a multiple of 8 / tile -> exercises partial last block
    # (no host-side padding anymore; garbage rows dropped per-row in-kernel)
    N2 = 19
    y_pred2 = jax.random.normal(k3, (N2, V), dtype=jnp.float32)
    y_tar2 = jax.random.randint(k4, (N2,), 0, V, dtype=jnp.int32)
    y_tar2 = y_tar2.at[3].set(0)
    for msk in (True, False):
        o = jax.block_until_ready(
            label_smoothing_loss(y_pred2, y_tar2, smoothing=smoothing, masked=msk))
        r = _reference_loss(y_pred2, y_tar2, smoothing, masked=msk)
        assert jnp.allclose(o, r, atol=1e-5, rtol=1e-5), (msk, o, r)

    # case 3: multi-tile grid exercising the interleaved tile assignment
    # (and the 2-way parallel axis on multi-TC chips)
    N3 = 64
    y_pred3 = jax.random.normal(k1, (N3, V), dtype=jnp.float32)
    y_tar3 = jax.random.randint(k2, (N3,), 0, V, dtype=jnp.int32)
    o3 = jax.block_until_ready(
        label_smoothing_loss(y_pred3, y_tar3, smoothing=smoothing,
                             masked=True, tile_n=8))
    r3 = _reference_loss(y_pred3, y_tar3, smoothing, masked=True)
    assert jnp.allclose(o3, r3, atol=1e-5, rtol=1e-5), (o3, r3)

    # case 3b: odd number of tiles -> exercises the clamped/skipped overhang
    N3b = 40
    o3b = jax.block_until_ready(
        label_smoothing_loss(y_pred3[:N3b], y_tar3[:N3b], smoothing=smoothing,
                             masked=True, tile_n=8))
    r3b = _reference_loss(y_pred3[:N3b], y_tar3[:N3b], smoothing, masked=True)
    assert jnp.allclose(o3b, r3b, atol=1e-5, rtol=1e-5), (o3b, r3b)

    # case 4: bf16 inputs (half the HBM traffic; math stays f32 in-kernel)
    y_pred_bf = y_pred.astype(jnp.bfloat16)
    o_bf = jax.block_until_ready(
        label_smoothing_loss(y_pred_bf, y_tar, smoothing=smoothing, masked=True))
    r_bf = _reference_loss(y_pred_bf, y_tar, smoothing, masked=True)
    assert jnp.allclose(o_bf, r_bf, atol=1e-4, rtol=1e-4), (o_bf, r_bf)

    print("KERNEL_OK")
</pallas_src>

<mosaic_0001>
module attributes {stable_mosaic.version = 11 : i64} {
  func.func @_label_smoothing_kernel(%arg0: i32, %arg1: i32, %arg2: memref<16x128xf32, #tpu.memory_space<vmem>>, %arg3: memref<16x1xi32, #tpu.memory_space<vmem>>, %arg4: memref<1x1x1xf32, #tpu.memory_space<vmem>>, %arg5: memref<1x1x1xf32, #tpu.memory_space<vmem>>) attributes {dimension_semantics = [#tpu.dimension_semantics<parallel>, #tpu.dimension_semantics<arbitrary>], iteration_bounds = array<i64: 1, 1>, scalar_prefetch = 0 : i64, scratch_operands = 0 : i64, tpu.core_type = #tpu.core_type<tc>, window_params = [{transform_indices = @transform_0, window_bounds = array<i64: 16, 128>}, {transform_indices = @transform_1, window_bounds = array<i64: 16, 1>}, {transform_indices = @transform_2, window_bounds = array<i64: 1, 1, 1>}, {transform_indices = @transform_3, window_bounds = array<i64: 1, 1, 1>}]} {
    %c0_i32 = arith.constant 0 : i32
    %0 = arith.cmpi eq, %arg1, %c0_i32 : i32
    %1 = arith.extui %0 : i1 to i32
    %c0_i32_0 = arith.constant 0 : i32
    %2 = arith.cmpi ne, %1, %c0_i32_0 : i32
    scf.if %2 {
      %cst = arith.constant 0.000000e+00 : f32
      %9 = vector.broadcast %cst : f32 to vector<1x1xf32>
      %c0 = arith.constant 0 : index
      %c0_3 = arith.constant 0 : index
      %c0_4 = arith.constant 0 : index
      %10 = vector.load %arg4[%c0, %c0_3, %c0_4] : memref<1x1x1xf32, #tpu.memory_space<vmem>>, vector<1x1x1xf32>
      %11 = vector.shape_cast %10 : vector<1x1x1xf32> to vector<1x1xf32>
      %12 = vector.shape_cast %9 : vector<1x1xf32> to vector<1x1x1xf32>
      tpu.vector_store %arg4[%c0, %c0_3, %c0_4], %12 {strides = array<i32>} : memref<1x1x1xf32, #tpu.memory_space<vmem>>, vector<1x1x1xf32>,
      %cst_5 = arith.constant 0.000000e+00 : f32
      %13 = vector.broadcast %cst_5 : f32 to vector<1x1xf32>
      %c0_6 = arith.constant 0 : index
      %c0_7 = arith.constant 0 : index
      %c0_8 = arith.constant 0 : index
      %14 = vector.load %arg5[%c0_6, %c0_7, %c0_8] : memref<1x1x1xf32, #tpu.memory_space<vmem>>, vector<1x1x1xf32>
      %15 = vector.shape_cast %14 : vector<1x1x1xf32> to vector<1x1xf32>
      %16 = vector.shape_cast %13 : vector<1x1xf32> to vector<1x1x1xf32>
      tpu.vector_store %arg5[%c0_6, %c0_7, %c0_8], %16 {strides = array<i32>} : memref<1x1x1xf32, #tpu.memory_space<vmem>>, vector<1x1x1xf32>,
    } else {
    }
    %c1_i32 = arith.constant 1 : i32
    %3 = arith.muli %arg1, %c1_i32 : i32
    %4 = arith.addi %3, %arg0 : i32
    %c16_i32 = arith.constant 16 : i32
    %5 = arith.muli %4, %c16_i32 : i32
    %c16_i32_1 = arith.constant 16 : i32
    %6 = arith.cmpi slt, %5, %c16_i32_1 : i32
    %7 = arith.extui %6 : i1 to i32
    %c0_i32_2 = arith.constant 0 : i32
    %8 = arith.cmpi ne, %7, %c0_i32_2 : i32
    scf.if %8 {
      %c0 = arith.constant 0 : index
      %c0_3 = arith.constant 0 : index
      %9 = vector.load %arg2[%c0, %c0_3] : memref<16x128xf32, #tpu.memory_space<vmem>>, vector<16x128xf32>
      %c0_4 = arith.constant 0 : index
      %c0_5 = arith.constant 0 : index
      %10 = vector.load %arg3[%c0_4, %c0_5] : memref<16x1xi32, #tpu.memory_space<vmem>>, vector<16x1xi32>
      %cst = arith.constant dense<0xFF800000> : vector<16xf32>
      %11 = vector.multi_reduction <maximumf>, %9, %cst [1] : vector<16x128xf32> to vector<16xf32>
      %12 = vector.shape_cast %11 : vector<16xf32> to vector<16x1xf32>
      %13 = vector.broadcast %12 : vector<16x1xf32> to vector<16x128xf32>
      %14 = arith.subf %9, %13 : vector<16x128xf32>
      %15 = math.exp %14 : vector<16x128xf32>
      %cst_6 = arith.constant dense<0.000000e+00> : vector<16xf32>
      %16 = vector.multi_reduction <add>, %15, %cst_6 [1] : vector<16x128xf32> to vector<16xf32>
      %17 = vector.shape_cast %16 : vector<16xf32> to vector<16x1xf32>
      %18 = math.log %17 : vector<16x1xf32>
      %19 = tpu.iota {dimensions = array<i32: 1>} : vector<16x128xi32>
      %20 = vector.broadcast %10 : vector<16x1xi32> to vector<16x128xi32>
      %21 = arith.cmpi eq, %19, %20 : vector<16x128xi32>
      %cst_7 = arith.constant 0.000000e+00 : f32
      %22 = vector.broadcast %cst_7 : f32 to vector<16x128xf32>
      %23 = arith.select %21, %14, %22 : vector<16x128xi1>, vector<16x128xf32>
      %cst_8 = arith.constant dense<0.000000e+00> : vector<16xf32>
      %24 = vector.multi_reduction <add>, %23, %cst_8 [1] : vector<16x128xf32> to vector<16xf32>
      %25 = vector.shape_cast %24 : vector<16xf32> to vector<16x1xf32>
      %cst_9 = arith.constant dense<0.000000e+00> : vector<16xf32>
      %26 = vector.multi_reduction <add>, %14, %cst_9 [1] : vector<16x128xf32> to vector<16xf32>
      %27 = vector.shape_cast %26 : vector<16xf32> to vector<16x1xf32>
      %28 = arith.subf %25, %18 : vector<16x1xf32>
      %cst_10 = arith.constant 0.899999976 : f32
      %29 = vector.broadcast %cst_10 : f32 to vector<16x1xf32>
      %30 = arith.mulf %29, %28 : vector<16x1xf32>
      %cst_11 = arith.constant 1.280000e+02 : f32
      %31 = vector.broadcast %cst_11 : f32 to vector<16x1xf32>
      %32 = arith.mulf %31, %18 : vector<16x1xf32>
      %33 = arith.subf %27, %32 : vector<16x1xf32>
      %cst_12 = arith.constant 7.812500e-04 : f32
      %34 = vector.broadcast %cst_12 : f32 to vector<16x1xf32>
      %35 = arith.mulf %34, %33 : vector<16x1xf32>
      %36 = arith.addf %30, %35 : vector<16x1xf32>
      %cst_13 = arith.constant 0.000000e+00 : f32
      %37 = vector.broadcast %cst_13 : f32 to vector<16x1xf32>
      %38 = arith.subf %37, %36 : vector<16x1xf32>
      %39 = tpu.iota {dimensions = array<i32: 0>} : vector<16x1xi32>
      %40 = vector.broadcast %5 : i32 to vector<16x1xi32>
      %41 = arith.addi %40, %39 : vector<16x1xi32>
      %c16_i32_14 = arith.constant 16 : i32
      %42 = vector.broadcast %c16_i32_14 : i32 to vector<16x1xi32>
      %43 = arith.cmpi slt, %41, %42 : vector<16x1xi32>
      %c0_i32_15 = arith.constant 0 : i32
      %44 = vector.broadcast %c0_i32_15 : i32 to vector<16x1xi32>
      %45 = arith.cmpi ne, %10, %44 : vector<16x1xi32>
      %46 = arith.andi %43, %45 : vector<16x1xi1>
      %c0_16 = arith.constant 0 : index
      %c0_17 = arith.constant 0 : index
      %c0_18 = arith.constant 0 : index
      %47 = vector.load %arg4[%c0_16, %c0_17, %c0_18] : memref<1x1x1xf32, #tpu.memory_space<vmem>>, vector<1x1x1xf32>
      %48 = vector.shape_cast %47 : vector<1x1x1xf32> to vector<1x1xf32>
      %cst_19 = arith.constant 0.000000e+00 : f32
      %49 = vector.broadcast %cst_19 : f32 to vector<16x1xf32>
      %50 = arith.select %46, %38, %49 : vector<16x1xi1>, vector<16x1xf32>
      %51 = vector.shape_cast %50 : vector<16x1xf32> to vector<1x16x1xf32>
      %cst_20 = arith.constant dense<0.000000e+00> : vector<1xf32>
      %52 = vector.multi_reduction <add>, %51, %cst_20 [1, 2] : vector<1x16x1xf32> to vector<1xf32>
      %53 = vector.shape_cast %52 : vector<1xf32> to vector<1x1x1xf32>
      %54 = vector.extract %53[0, 0, 0] : f32 from vector<1x1x1xf32>
      %55 = vector.broadcast %54 : f32 to vector<1x1xf32>
      %56 = arith.addf %48, %55 : vector<1x1xf32>
      %c0_21 = arith.constant 0 : index
      %c0_22 = arith.constant 0 : index
      %c0_23 = arith.constant 0 : index
      %57 = vector.load %arg4[%c0_21, %c0_22, %c0_23] : memref<1x1x1xf32, #tpu.memory_space<vmem>>, vector<1x1x1xf32>
      %58 = vector.shape_cast %57 : vector<1x1x1xf32> to vector<1x1xf32>
      %59 = vector.shape_cast %56 : vector<1x1xf32> to vector<1x1x1xf32>
      tpu.vector_store %arg4[%c0_21, %c0_22, %c0_23], %59 {strides = array<i32>} : memref<1x1x1xf32, #tpu.memory_space<vmem>>, vector<1x1x1xf32>,
      %c0_24 = arith.constant 0 : index
      %c0_25 = arith.constant 0 : index
      %c0_26 = arith.constant 0 : index
      %60 = vector.load %arg5[%c0_24, %c0_25, %c0_26] : memref<1x1x1xf32, #tpu.memory_space<vmem>>, vector<1x1x1xf32>
      %61 = vector.shape_cast %60 : vector<1x1x1xf32> to vector<1x1xf32>
      %62 = arith.extui %46 : vector<16x1xi1> to vector<16x1xi32>
      %63 = arith.sitofp %62 : vector<16x1xi32> to vector<16x1xf32>
      %64 = vector.shape_cast %63 : vector<16x1xf32> to vector<1x16x1xf32>
      %cst_27 = arith.constant dense<0.000000e+00> : vector<1xf32>
      %65 = vector.multi_reduction <add>, %64, %cst_27 [1, 2] : vector<1x16x1xf32> to vector<1xf32>
      %66 = vector.shape_cast %65 : vector<1xf32> to vector<1x1x1xf32>
      %67 = vector.extract %66[0, 0, 0] : f32 from vector<1x1x1xf32>
      %68 = vector.broadcast %67 : f32 to vector<1x1xf32>
      %69 = arith.addf %61, %68 : vector<1x1xf32>
      %c0_28 = arith.constant 0 : index
      %c0_29 = arith.constant 0 : index
      %c0_30 = arith.constant 0 : index
      %70 = vector.load %arg5[%c0_28, %c0_29, %c0_30] : memref<1x1x1xf32, #tpu.memory_space<vmem>>, vector<1x1x1xf32>
      %71 = vector.shape_cast %70 : vector<1x1x1xf32> to vector<1x1xf32>
      %72 = vector.shape_cast %69 : vector<1x1xf32> to vector<1x1x1xf32>
      tpu.vector_store %arg5[%c0_28, %c0_29, %c0_30], %72 {strides = array<i32>} : memref<1x1x1xf32, #tpu.memory_space<vmem>>, vector<1x1x1xf32>,
    } else {
    }
    return
  }
  func.func @transform_0(%arg0: i32, %arg1: i32) -> (i32, i32) {
    %c1_i32 = arith.constant 1 : i32
    %0 = arith.muli %arg1, %c1_i32 : i32
    %1 = arith.addi %0, %arg0 : i32
    %c0_i32 = arith.constant 0 : i32
    %2 = arith.minsi %1, %c0_i32 : i32
    %c0_i32_0 = arith.constant 0 : i32
    %c0_i32_1 = arith.constant 0 : i32
    return %2, %c0_i32_0 : i32, i32
  }
  func.func @transform_1(%arg0: i32, %arg1: i32) -> (i32, i32) {
    %c1_i32 = arith.constant 1 : i32
    %0 = arith.muli %arg1, %c1_i32 : i32
    %1 = arith.addi %0, %arg0 : i32
    %c0_i32 = arith.constant 0 : i32
    %2 = arith.minsi %1, %c0_i32 : i32
    %c0_i32_0 = arith.constant 0 : i32
    %c0_i32_1 = arith.constant 0 : i32
    return %2, %c0_i32_0 : i32, i32
  }
  func.func @transform_2(%arg0: i32, %arg1: i32) -> (i32, i32, i32) {
    %c0_i32 = arith.constant 0 : i32
    %c0_i32_0 = arith.constant 0 : i32
    %c0_i32_1 = arith.constant 0 : i32
    return %arg0, %c0_i32, %c0_i32_0 : i32, i32, i32
  }
  func.func @transform_3(%arg0: i32, %arg1: i32) -> (i32, i32, i32) {
    %c0_i32 = arith.constant 0 : i32
    %c0_i32_0 = arith.constant 0 : i32
    %c0_i32_1 = arith.constant 0 : i32
    return %arg0, %c0_i32, %c0_i32_0 : i32, i32, i32
  }
}

</mosaic_0001>

<bundles_post_ra>
// kernel: tpu_custom_call.1
= control target key start
LH: loop header
LB: loop body
LE: loop exit
PB: predicated region body
PF: predicated region fallthrough
CT: control target
= control target key end

     0   :  { %9 = vsyncpa [#allocation3], 0  ;;  %v308_v2 = vmov 0   ;;  %s392_s0 = inlined_call_operand.vmem [shape: f32[16,128], index: 0, kind: input, shape index: {}]   ;;  %s393_s1 = inlined_call_operand.vmem [shape: s32[16,1], index: 1, kind: input, shape index: {}]   ;;  %s394_s2 = inlined_call_operand.hbm [shape: f32[1,1,1], index: 2, kind: output, shape index: {0}]   ;;  %s395_s3 = inlined_call_operand.hbm [shape: f32[1,1,1], index: 3, kind: output, shape index: {1}]  }
   0x1   :  { %v92_v0 = vld [vmem:[%s392_s0] sm:$0xff]  ;;  %250 = vset.pattern.permute.xlu1 %v308_v2 }
   0x2   :  { %v338_v1 = vld [vmem:[%s393_s1] sm:$0xff]  ;;  %96 = vmax.xlane.f32.xlu0 %v92_v0 }
   0x3   :  { %10 = vsyncpa [#allocation5], 0  ;;  %v93_v3 = vld [vmem:[%s392_s0 + $0x8] sm:$0xff]  ;;  %117 = vperm.xlu1 %250, %v338_v1   ;;  %251 = vset.pattern.permute.xlu0 %v308_v2  ;;  %v114_v11 = vlaneseq  ;;  %vm156_vm2 = vcmp.ne.s32.totalorder %v338_v1, 0  ;;  %v309_v19 = vmov 0.0   ;;  %vm163_vm4 = vcmask 7168  }
   0x4   :  { %v347_v4 = vld [vmem:[%s393_s1 + $0x8] sm:$0xff]  ;;  %v240_v20 = vsel %vm156_vm2, 1.0, %v309_v19  ;;  %vm83_vm5 = vcmask 0   ;;  %s310_s0 = smov [#allocation2]   ;;  %s311_s21 = smov [#allocation4]  }
   0x5   :  { %v115_v13 = vand.u32 127, %v114_v11  ;;  %vm157_vm3 = vcmp.ne.s32.totalorder %v347_v4, 0  ;;  %v185_v22 = vsel %vm163_vm4, %v240_v20, 0.0  ;;  %84 = vst.msk [vmem:[#allocation2] sm:$0x1] %vm83_vm5, %v309_v19  ;;  %s206_s1 = sshll.u32 %s310_s0, 4  ;;  %s207_s1 = int_to_ptr.vmem [resolvable:$true] %s206_s1 }
   0x6   :  { %98 = vmax.xlane.f32.xlu0 %v93_v3  ;;  %v241_v21 = vsel %vm157_vm3, 1.0, %v309_v19  ;;  %85 = vst.msk [vmem:[#allocation4] sm:$0x1] %vm83_vm5, %v309_v19  ;;  %s216_s22 = sshll.u32 %s311_s21, 4  ;;  %s260_s24 = scalar_lea.vmem %s207_s1, 16  ;;  %s217_s22 = int_to_ptr.vmem [resolvable:$true] %s216_s22 }
   0x7   :  { %120 = vperm.xlu1 %250, %v347_v4   ;;  %v186_v23 = vsel %vm163_vm4, %v241_v21, 0.0  ;;  %p261_p0 = scmp.ne.s32.totalorder %s207_s1, %s260_s24  ;;  %s264_s25 = scalar_lea.vmem %s207_s1, 32 }
   0x8   :  { %v187_v24 = vadd.f32 %v186_v23, %v185_v22  ;;  %p265_p1 = scmp.lt.s32.totalorder %s207_s1, %s207_s1  ;;  %p266_p2 = scmp.lt.s32.totalorder %s264_s25, %s260_s24 }
   0xa   :  { %p267_p3 = por %p266_p2, %p265_p1 }
   0xc   :  { %v160_v4 = vld [vmem:[#allocation2] sm:$0x1]  ;;  %p268_p4 = pnand %p267_p3, %p261_p0 }
  0x82   :  { %v118_v12 = vpop.permute.xlu1 %117 }
  0x83   :  { %vm122_vm0 = vcmp.eq.s32.totalorder %v115_v13, %v118_v12 }
  0x86   :  { %v121_v15 = vpop.permute.xlu1 %120 }
  0x87   :  { %vm123_vm1 = vcmp.eq.s32.totalorder %v115_v13, %v121_v15 }
  0x8f   :  { %v97_v5 = vpop.xlane.xlu0 %96 }
  0x90   :  { %v100_v6 = vsub.f32 %v92_v0, %v97_v5 }
  0x92   :  { %v102_v7 = vmul.f32 1.442695, %v100_v6  ;;  %v124_v17 = vsel %vm122_vm0, %v100_v6, 0.0 }
  0x93   :  { %v99_v8 = vpop.xlane.xlu0 %98 }
  0x94   :  { %252 = vpow2.f32 %v102_v7  ;;  %v101_v9 = vsub.f32 %v93_v3, %v99_v8  ;;  %v180_v7 = vld [vmem:[#allocation4] sm:$0x1] }
  0x96   :  { %v104_v10 = vmul.f32 1.442695, %v101_v9  ;;  %v125_v18 = vsel %vm123_vm1, %v101_v9, 0.0 }
  0x98   :  { %254 = vpow2.f32 %v104_v10 }
  0x9e   :  { %v253_v14 = vpop.eup %252 }
  0x9f   :  { %106 = vadd.xlane.f32.xlu0 %v253_v14 }
  0xa2   :  { %v255_v16 = vpop.eup %254 }
  0xa3   :  { %126 = vadd.xlane.f32.xlu0 %v124_v17  ;;  %108 = vadd.xlane.f32.xlu1 %v255_v16 }
  0xa7   :  { %128 = vadd.xlane.f32.xlu0 %v125_v18 }
  0xab   :  { %130 = vadd.xlane.f32.xlu0 %v100_v6 }
  0xaf   :  { %132 = vadd.xlane.f32.xlu0 %v101_v9 }
 0x12c   :  { %v107_v25 = vpop.xlane.xlu0 %106 }
 0x12d   :  { %256 = vlog2.f32 %v107_v25 }
 0x130   :  { %v109_v26 = vpop.xlane.xlu1 %108  ;;  %v127_v27 = vpop.xlane.xlu0 %126 }
 0x131   :  { %258 = vlog2.f32 %v109_v26 }
 0x134   :  { %v129_v28 = vpop.xlane.xlu0 %128 }
 0x137   :  { %v257_v29 = vpop.eup %256 }
 0x138   :  { %v111_v30 = vmul.f32 0.6931472, %v257_v29  ;;  %v131_v31 = vpop.xlane.xlu0 %130 }
 0x13a   :  { %v134_v32 = vsub.f32 %v127_v27, %v111_v30  ;;  %v138_v33 = vmul.f32 128.0, %v111_v30 }
 0x13b   :  { %v259_v34 = vpop.eup %258 }
 0x13c   :  { %v113_v35 = vmul.f32 0.6931472, %v259_v34  ;;  %v140_v36 = vsub.f32 %v131_v31, %v138_v33  ;;  %v136_v37 = vmul.f32 0.9, %v134_v32  ;;  %v133_v41 = vpop.xlane.xlu0 %132 }
 0x13e   :  { %v135_v38 = vsub.f32 %v129_v28, %v113_v35  ;;  %v142_v39 = vmul.f32 0.00078125, %v140_v36  ;;  %v139_v40 = vmul.f32 128.0, %v113_v35 }
 0x140   :  { %v144_v42 = vadd.f32 %v142_v39, %v136_v37  ;;  %v141_v43 = vsub.f32 %v133_v41, %v139_v40  ;;  %v137_v44 = vmul.f32 0.9, %v135_v38 }
 0x142   :  { %v146_v45 = vsub.f32 0.0, %v144_v42  ;;  %v143_v46 = vmul.f32 0.00078125, %v141_v43 }
 0x144   :  { %v145_v47 = vadd.f32 %v143_v46, %v137_v44  ;;  %v161_v49 = vsel %vm156_vm2, %v146_v45, 0.0 }
 0x145   :  { %v164_v51 = vsel %vm163_vm4, %v161_v49, 0.0 }
 0x146   :  { %v147_v48 = vsub.f32 0.0, %v145_v47 }
 0x148   :  { %v162_v50 = vsel %vm157_vm3, %v147_v48, 0.0 }
 0x149   :  { %v165_v52 = vsel %vm163_vm4, %v162_v50, 0.0 }
 0x14a   :  { %v166_v53 = vadd.f32 %v165_v52, %v164_v51 }
 0x14c   :  { %167 = vadd.xlane.f32.xlu0 %v166_v53 }
 0x150   :  { %188 = vadd.xlane.f32.xlu0 %v187_v24 }
 0x1d9   :  { %v168_v54 = vpop.xlane.xlu0 %167 }
 0x1da   :  { %v169_v55 = vrot.slane %v168_v54, 4 }
 0x1dc   :  { %v170_v56 = vadd.f32 %v169_v55, %v168_v54 }
 0x1dd   :  { %v189_v57 = vpop.xlane.xlu0 %188 }
 0x1de   :  { %v171_v58 = vrot.slane %v170_v56, 2  ;;  %v190_v59 = vrot.slane %v189_v57, 4 }
 0x1e0   :  { %v191_v60 = vadd.f32 %v190_v59, %v189_v57  ;;  %v172_v61 = vadd.f32 %v171_v58, %v170_v56 }
 0x1e2   :  { %v192_v62 = vrot.slane %v191_v60, 2  ;;  %v173_v63 = vrot.slane %v172_v61, 1 }
 0x1e4   :  { %v193_v0 = vadd.f32 %v192_v62, %v191_v60  ;;  %v174_v1 = vadd.f32 %v173_v63, %v172_v61 }
 0x1e6   :  { %242 = vpush %v174_v1  ;;  %v194_v2 = vrot.slane %v193_v0, 1 }
 0x1e8   :  { %v195_v3 = vadd.f32 %v194_v2, %v193_v0 }
 0x1ea   :  { %244 = vpush %v195_v3 }
 0x217   :  { %s243_s20 = spop %242 }
 0x218   :  { %v176_v5 = vstv %s243_s20 }
 0x219   :  { %v177_v6 = vadd.f32 %v176_v5, %v160_v4 }
 0x21b   :  { %179 = vst.msk [vmem:[#allocation2] sm:$0x1] %vm83_vm5, %v177_v6  ;;  %s245_s23 = spop %244 }
 0x21c   :  { %v197_v8 = vstv %s245_s23 }
 0x21d   :  { %271 = shalt.err (!%p268_p4)
}
 0x21e   :  { %s272_s28 = scalar_lea.hbm %s394_s2, 16 }
 0x21f   :  { %p273_p5 = scmp.ne.s32.totalorder %s394_s2, %s272_s28  ;;  %p276_p6 = scmp.lt.u32.totalorder %s272_s28, %s394_s2 }
 0x221   :  { %p278_p7 = pnand %p276_p6, %p273_p5 }
 0x223   :  { %281 = shalt.err (!%p278_p7)
}
 0x224   :  { %209 = dma.vmem_to_hbm [thread:$0]  %s207_s1, 16, %s394_s2, [#allocation3]   ;;  %v198_v9 = vadd.f32 %v197_v8, %v180_v7 }
 0x225   :  { %s282_s8 = scalar_lea.vmem %s217_s22, 16  ;;  %s286_s9 = scalar_lea.vmem %s217_s22, 32 }
 0x226   :  { %199 = vst.msk [vmem:[#allocation4] sm:$0x1] %vm83_vm5, %v198_v9  ;;  %p283_p8 = scmp.ne.s32.totalorder %s217_s22, %s282_s8  ;;  %p287_p9 = scmp.lt.s32.totalorder %s217_s22, %s217_s22 }
 0x227   :  { %p288_p10 = scmp.lt.s32.totalorder %s286_s9, %s282_s8 }
 0x229   :  { %p289_p11 = por %p288_p10, %p287_p9 }
 0x22b   :  { %p290_p12 = pnand %p289_p11, %p283_p8 }
 0x22d   :  { %293 = shalt.err (!%p290_p12)
}
 0x22e   :  { %s294_s12 = scalar_lea.hbm %s395_s3, 16 }
 0x22f   :  { %p295_p13 = scmp.ne.s32.totalorder %s395_s3, %s294_s12  ;;  %p298_p0 = scmp.lt.u32.totalorder %s294_s12, %s395_s3 }
 0x231   :  { %p300_p1 = pnand %p298_p0, %p295_p13 }
 0x233   :  { %303 = shalt.err (!%p300_p1)
}
 0x234   :  { %219 = dma.vmem_to_hbm [thread:$0]  %s217_s22, 16, %s395_s3, [#allocation5]  }
 0x235   :  { %304 = dma.done.wait [#allocation3], 16  }
 0x236   :  { %305 = vsyncadd [#allocation3], 4294967280 }
 0x237   :  { %306 = dma.done.wait [#allocation5], 16  }
 0x238   :  { %307 = vsyncadd [#allocation5], 4294967280 }
 0x239   :  { %226 = vsyncpa [#allocation3], 1 }
 0x23a   :  { %227 = vsyncpa [#allocation5], 1 }

</bundles_post_ra>
